<compile_context>
chip_gen: v5e
topology: v5e:2x2
jax: 0.10.0
libtpu: 0.0.40
codegen_flags: <defaults>
</compile_context>

<pallas_src>
import functools

import jax
import jax.numpy as jnp
from jax.experimental import pallas as pl
from jax.experimental.pallas import tpu as pltpu

LATENT_DIM = 10
PARAM_DIM = 3
OUTPUT_RANGE = (0.5, 6.0)
H1, H2 = 128, 256


def _round_up(n, m):
    return ((n + m - 1) // m) * m


def _generator_kernel(x_ref, w1_ref, b1_ref, w2_ref, b2_ref, w3_ref, b3_ref,
                      o_ref, *, scale, shift):
    # x_ref: (bm, latent_dim) tile of the (padded) batch.
    x = x_ref[...]

    # Layer 1: Linear + ReLU (MXU matmul, f32 accumulate; bias broadcasts (1,H)->(bm,H)).
    h1 = jnp.dot(x, w1_ref[...], preferred_element_type=jnp.float32) + b1_ref[...]
    h1 = jnp.maximum(h1, 0.0)

    # Layer 2: Linear + ReLU.
    h2 = jnp.dot(h1, w2_ref[...], preferred_element_type=jnp.float32) + b2_ref[...]
    h2 = jnp.maximum(h2, 0.0)

    # Layer 3: Linear (narrow N == PARAM_DIM output; no lane padding of the result).
    y = jnp.dot(h2, w3_ref[...], preferred_element_type=jnp.float32) + b3_ref[...]

    # tanh (EUP) then single-FMA affine rescale into [min_val, max_val].
    o_ref[...] = (scale * jnp.tanh(y) + shift).astype(o_ref.dtype)


def generator_forward(x, params, output_range=OUTPUT_RANGE, *, bm=None):
    """Fused MLP forward. x: (B, latent_dim) float32 -> (B, PARAM_DIM) float32."""
    w1, b1, w2, b2, w3, b3 = params
    B, L = x.shape
    N = w3.shape[1]                      # = PARAM_DIM
    min_val, max_val = output_range
    scale = (float(max_val) - float(min_val)) * 0.5
    shift = (float(max_val) + float(min_val)) * 0.5

    # ---- choose batch tile ---------------------------------------------------
    # Large tiles amortize the ~0.35us/step overhead.  For big batches we force
    # an EVEN number of grid steps so v7x's two TensorCores split the "parallel"
    # axis evenly; bm is capped at ~1024 which keeps VMEM ~5 MiB (safe on v5e's
    # 16 MiB scoped default).
    if bm is None:
        target = 1024
        if B >= 2 * target:
            pairs = -(-B // (2 * target))          # ceil(B / (2*target))
            steps = 2 * pairs                      # even step count
            bm = _round_up(-(-B // steps), 8)      # ceil(B/steps), sublane-aligned
        else:
            bm = max(8, _round_up(-(-B // 2), 8))  # <=2 steps for small batches
    bm = _round_up(int(bm), 8)
    B_pad = _round_up(B, bm)

    x_pad = x if B_pad == B else jnp.pad(x, ((0, B_pad - B), (0, 0)))

    kernel = functools.partial(_generator_kernel, scale=scale, shift=shift)

    flops = 2 * B_pad * (L * H1 + H1 * H2 + H2 * N)
    transcendentals = B_pad * N  # tanh
    bytes_accessed = 4 * (B_pad * L + B_pad * N
                          + L * H1 + H1 + H1 * H2 + H2 + H2 * N + N)
    cost = pl.CostEstimate(flops=flops,
                           transcendentals=transcendentals,
                           bytes_accessed=bytes_accessed)

    out = pl.pallas_call(
        kernel,
        out_shape=jax.ShapeDtypeStruct((B_pad, N), jnp.float32),
        grid_spec=pltpu.PrefetchScalarGridSpec(
            num_scalar_prefetch=0,
            grid=(B_pad // bm,),
            in_specs=[
                # batch tile of the input
                pl.BlockSpec((bm, L), lambda i: (i, 0)),
                # weights/biases: full arrays, resident across the batch grid
                pl.BlockSpec((L, H1), lambda i: (0, 0)),
                pl.BlockSpec((1, H1), lambda i: (0, 0)),
                pl.BlockSpec((H1, H2), lambda i: (0, 0)),
                pl.BlockSpec((1, H2), lambda i: (0, 0)),
                pl.BlockSpec((H2, N), lambda i: (0, 0)),
                pl.BlockSpec((1, N), lambda i: (0, 0)),
            ],
            # Narrow (bm, PARAM_DIM) output block: 12 B/row to HBM instead of 512 B/row.
            out_specs=pl.BlockSpec((bm, N), lambda i: (i, 0)),
        ),
        compiler_params=pltpu.CompilerParams(
            dimension_semantics=("parallel",)),
        cost_estimate=cost,
    )(x_pad, w1, b1, w2, b2, w3, b3)

    # Strip batch padding only when it exists (no column slice needed anymore).
    return out if B_pad == B else out[:B]


def init_params(key):
    """Deterministic Kaiming-uniform (fan_in, relu) init, zero biases."""
    def kaiming_uniform(k, fan_in, fan_out):
        # gain = sqrt(2) for ReLU; bound = gain * sqrt(3 / fan_in)
        bound = jnp.sqrt(2.0) * jnp.sqrt(3.0 / fan_in)
        # stored as (in, out) == transpose of PyTorch's (out, in) weight
        return jax.random.uniform(k, (fan_in, fan_out), jnp.float32,
                                  minval=-bound, maxval=bound)

    k1, k2, k3 = jax.random.split(key, 3)
    w1 = kaiming_uniform(k1, LATENT_DIM, H1)
    b1 = jnp.zeros((1, H1), jnp.float32)
    w2 = kaiming_uniform(k2, H1, H2)
    b2 = jnp.zeros((1, H2), jnp.float32)
    w3 = kaiming_uniform(k3, H2, PARAM_DIM)
    b3 = jnp.zeros((1, PARAM_DIM), jnp.float32)
    return (w1, b1, w2, b2, w3, b3)


def _reference_forward(x, params, output_range=OUTPUT_RANGE):
    w1, b1, w2, b2, w3, b3 = params
    h = jnp.maximum(x @ w1 + b1, 0.0)
    h = jnp.maximum(h @ w2 + b2, 0.0)
    y = jnp.tanh(h @ w3 + b3)
    mn, mx = output_range
    return mn + (mx - mn) * (y + 1.0) / 2.0


if __name__ == "__main__":
    key = jax.random.PRNGKey(0)
    k_params, k_small, k_big = jax.random.split(key, 3)

    params = init_params(k_params)

    # Small-shape correctness check (batch=4, latent_dim=10).
    x_small = jax.random.normal(k_small, (4, LATENT_DIM), jnp.float32)
    out_small = jax.block_until_ready(generator_forward(x_small, params))
    ref_small = _reference_forward(x_small, params)
    assert out_small.shape == (4, PARAM_DIM)
    assert jnp.allclose(out_small, ref_small, atol=1e-5, rtol=1e-5)
    assert bool(jnp.all(out_small >= OUTPUT_RANGE[0]))
    assert bool(jnp.all(out_small <= OUTPUT_RANGE[1]))

    # Non-multiple batch to exercise padding + the 2-step "parallel" grid path.
    x_big = jax.random.normal(k_big, (1000, LATENT_DIM), jnp.float32)
    out_big = jax.block_until_ready(generator_forward(x_big, params))
    ref_big = _reference_forward(x_big, params)
    assert out_big.shape == (1000, PARAM_DIM)
    assert jnp.allclose(out_big, ref_big, atol=1e-5, rtol=1e-5)
    assert bool(jnp.all(out_big >= OUTPUT_RANGE[0]))
    assert bool(jnp.all(out_big <= OUTPUT_RANGE[1]))

    print("KERNEL_OK")
</pallas_src>

<mosaic_0001>
module attributes {stable_mosaic.version = 11 : i64} {
  func.func @_generator_kernel(%arg0: i32, %arg1: memref<8x10xf32, #tpu.memory_space<vmem>>, %arg2: memref<10x128xf32, #tpu.memory_space<vmem>>, %arg3: memref<1x128xf32, #tpu.memory_space<vmem>>, %arg4: memref<128x256xf32, #tpu.memory_space<vmem>>, %arg5: memref<1x256xf32, #tpu.memory_space<vmem>>, %arg6: memref<256x3xf32, #tpu.memory_space<vmem>>, %arg7: memref<1x3xf32, #tpu.memory_space<vmem>>, %arg8: memref<8x3xf32, #tpu.memory_space<vmem>>) attributes {dimension_semantics = [#tpu.dimension_semantics<parallel>], iteration_bounds = array<i64: 1>, scalar_prefetch = 0 : i64, scratch_operands = 0 : i64, tpu.core_type = #tpu.core_type<tc>, window_params = [{transform_indices = @transform_0, window_bounds = array<i64: 8, 10>}, {pipeline_mode = #tpu.pipeline_mode<synchronous>, transform_indices = @transform_1, window_bounds = array<i64: 10, 128>}, {pipeline_mode = #tpu.pipeline_mode<synchronous>, transform_indices = @transform_2, window_bounds = array<i64: 1, 128>}, {pipeline_mode = #tpu.pipeline_mode<synchronous>, transform_indices = @transform_3, window_bounds = array<i64: 128, 256>}, {pipeline_mode = #tpu.pipeline_mode<synchronous>, transform_indices = @transform_4, window_bounds = array<i64: 1, 256>}, {pipeline_mode = #tpu.pipeline_mode<synchronous>, transform_indices = @transform_5, window_bounds = array<i64: 256, 3>}, {pipeline_mode = #tpu.pipeline_mode<synchronous>, transform_indices = @transform_6, window_bounds = array<i64: 1, 3>}, {transform_indices = @transform_7, window_bounds = array<i64: 8, 3>}]} {
    %c0 = arith.constant 0 : index
    %c0_0 = arith.constant 0 : index
    %0 = vector.load %arg1[%c0, %c0_0] : memref<8x10xf32, #tpu.memory_space<vmem>>, vector<8x10xf32>
    %c0_1 = arith.constant 0 : index
    %c0_2 = arith.constant 0 : index
    %1 = vector.load %arg2[%c0_1, %c0_2] : memref<10x128xf32, #tpu.memory_space<vmem>>, vector<10x128xf32>
    %cst = arith.constant dense<0.000000e+00> : vector<8x128xf32>
    %2 = tpu.matmul %0, %1, %cst {dimension_numbers = #tpu.dot_dimension_numbers<[1], [0], [0], [1], [0, 0, 1, 1], [], []>} : vector<8x10xf32>, vector<10x128xf32>, vector<8x128xf32> -> vector<8x128xf32>
    %c0_3 = arith.constant 0 : index
    %c0_4 = arith.constant 0 : index
    %3 = vector.load %arg3[%c0_3, %c0_4] : memref<1x128xf32, #tpu.memory_space<vmem>>, vector<1x128xf32>
    %4 = vector.broadcast %3 : vector<1x128xf32> to vector<8x128xf32>
    %5 = arith.addf %2, %4 : vector<8x128xf32>
    %cst_5 = arith.constant 0.000000e+00 : f32
    %6 = vector.broadcast %cst_5 : f32 to vector<8x128xf32>
    %7 = arith.maximumf %5, %6 : vector<8x128xf32>
    %c0_6 = arith.constant 0 : index
    %c0_7 = arith.constant 0 : index
    %8 = vector.load %arg4[%c0_6, %c0_7] : memref<128x256xf32, #tpu.memory_space<vmem>>, vector<128x256xf32>
    %cst_8 = arith.constant dense<0.000000e+00> : vector<8x256xf32>
    %9 = tpu.matmul %7, %8, %cst_8 {dimension_numbers = #tpu.dot_dimension_numbers<[1], [0], [0], [1], [0, 0, 1, 1], [], []>} : vector<8x128xf32>, vector<128x256xf32>, vector<8x256xf32> -> vector<8x256xf32>
    %c0_9 = arith.constant 0 : index
    %c0_10 = arith.constant 0 : index
    %10 = vector.load %arg5[%c0_9, %c0_10] : memref<1x256xf32, #tpu.memory_space<vmem>>, vector<1x256xf32>
    %11 = vector.broadcast %10 : vector<1x256xf32> to vector<8x256xf32>
    %12 = arith.addf %9, %11 : vector<8x256xf32>
    %cst_11 = arith.constant 0.000000e+00 : f32
    %13 = vector.broadcast %cst_11 : f32 to vector<8x256xf32>
    %14 = arith.maximumf %12, %13 : vector<8x256xf32>
    %c0_12 = arith.constant 0 : index
    %c0_13 = arith.constant 0 : index
    %15 = vector.load %arg6[%c0_12, %c0_13] : memref<256x3xf32, #tpu.memory_space<vmem>>, vector<256x3xf32>
    %cst_14 = arith.constant dense<0.000000e+00> : vector<8x3xf32>
    %16 = tpu.matmul %14, %15, %cst_14 {dimension_numbers = #tpu.dot_dimension_numbers<[1], [0], [0], [1], [0, 0, 1, 1], [], []>} : vector<8x256xf32>, vector<256x3xf32>, vector<8x3xf32> -> vector<8x3xf32>
    %c0_15 = arith.constant 0 : index
    %c0_16 = arith.constant 0 : index
    %17 = vector.load %arg7[%c0_15, %c0_16] : memref<1x3xf32, #tpu.memory_space<vmem>>, vector<1x3xf32>
    %18 = vector.broadcast %17 : vector<1x3xf32> to vector<8x3xf32>
    %19 = arith.addf %16, %18 : vector<8x3xf32>
    %20 = math.tanh %19 : vector<8x3xf32>
    %cst_17 = arith.constant 2.750000e+00 : f32
    %21 = vector.broadcast %cst_17 : f32 to vector<8x3xf32>
    %22 = arith.mulf %21, %20 : vector<8x3xf32>
    %cst_18 = arith.constant 3.250000e+00 : f32
    %23 = vector.broadcast %cst_18 : f32 to vector<8x3xf32>
    %24 = arith.addf %22, %23 : vector<8x3xf32>
    %c0_19 = arith.constant 0 : index
    %c0_20 = arith.constant 0 : index
    %25 = vector.load %arg8[%c0_19, %c0_20] : memref<8x3xf32, #tpu.memory_space<vmem>>, vector<8x3xf32>
    tpu.vector_store %arg8[%c0_19, %c0_20], %24 {strides = array<i32>} : memref<8x3xf32, #tpu.memory_space<vmem>>, vector<8x3xf32>,
    return
  }
  func.func @transform_0(%arg0: i32) -> (i32, i32) {
    %c0_i32 = arith.constant 0 : i32
    %c0_i32_0 = arith.constant 0 : i32
    return %arg0, %c0_i32 : i32, i32
  }
  func.func @transform_1(%arg0: i32) -> (i32, i32) {
    %c0_i32 = arith.constant 0 : i32
    %c0_i32_0 = arith.constant 0 : i32
    %c0_i32_1 = arith.constant 0 : i32
    return %c0_i32, %c0_i32_0 : i32, i32
  }
  func.func @transform_2(%arg0: i32) -> (i32, i32) {
    %c0_i32 = arith.constant 0 : i32
    %c0_i32_0 = arith.constant 0 : i32
    %c0_i32_1 = arith.constant 0 : i32
    return %c0_i32, %c0_i32_0 : i32, i32
  }
  func.func @transform_3(%arg0: i32) -> (i32, i32) {
    %c0_i32 = arith.constant 0 : i32
    %c0_i32_0 = arith.constant 0 : i32
    %c0_i32_1 = arith.constant 0 : i32
    return %c0_i32, %c0_i32_0 : i32, i32
  }
  func.func @transform_4(%arg0: i32) -> (i32, i32) {
    %c0_i32 = arith.constant 0 : i32
    %c0_i32_0 = arith.constant 0 : i32
    %c0_i32_1 = arith.constant 0 : i32
    return %c0_i32, %c0_i32_0 : i32, i32
  }
  func.func @transform_5(%arg0: i32) -> (i32, i32) {
    %c0_i32 = arith.constant 0 : i32
    %c0_i32_0 = arith.constant 0 : i32
    %c0_i32_1 = arith.constant 0 : i32
    return %c0_i32, %c0_i32_0 : i32, i32
  }
  func.func @transform_6(%arg0: i32) -> (i32, i32) {
    %c0_i32 = arith.constant 0 : i32
    %c0_i32_0 = arith.constant 0 : i32
    %c0_i32_1 = arith.constant 0 : i32
    return %c0_i32, %c0_i32_0 : i32, i32
  }
  func.func @transform_7(%arg0: i32) -> (i32, i32) {
    %c0_i32 = arith.constant 0 : i32
    %c0_i32_0 = arith.constant 0 : i32
    return %arg0, %c0_i32 : i32, i32
  }
}

</mosaic_0001>

<bundles_post_ra>
// kernel: tpu_custom_call.1
= control target key start
LH: loop header
LB: loop body
LE: loop exit
PB: predicated region body
PF: predicated region fallthrough
CT: control target
= control target key end

     0   :  { %12 = vsyncpa [#allocation3], 0  ;;  %s575_s0 = inlined_call_operand.vmem [shape: f32[8,10], index: 0, kind: input, shape index: {}]   ;;  %s576_s1 = inlined_call_operand.hbm [shape: f32[10,128], index: 1, kind: input, shape index: {}]   ;;  %s577_s2 = inlined_call_operand.hbm [shape: f32[1,128], index: 2, kind: input, shape index: {}]   ;;  %s578_s3 = inlined_call_operand.vmem [shape: f32[128,256], index: 3, kind: input, shape index: {}]   ;;  %s579_s4 = inlined_call_operand.vmem [shape: f32[1,256], index: 4, kind: input, shape index: {}]   ;;  %s580_s5 = inlined_call_operand.vmem [shape: f32[256,3], index: 5, kind: input, shape index: {}]   ;;  %s581_s6 = inlined_call_operand.vmem [shape: f32[1,3], index: 6, kind: input, shape index: {}]   ;;  %s582_s7 = inlined_call_operand.vmem [shape: f32[8,3], index: 7, kind: output, shape index: {}]  }
   0x1   :  { %s20_s26 = sshll.u32 %s576_s1, 4  ;;  %s21_s26 = int_to_ptr.hbm [resolvable:$true] %s20_s26 }
   0x2   :  { %13 = vsyncpa [#allocation5], 0  ;;  %s321_s27 = smov [#allocation2]   ;;  %s34_s8 = sshll.u32 %s577_s2, 4  ;;  %s35_s8 = int_to_ptr.hbm [resolvable:$true] %s34_s8 }
   0x3   :  { %s22_s28 = sshll.u32 %s321_s27, 4  ;;  %s322_s9 = smov 128   ;;  %s23_s28 = int_to_ptr.vmem [resolvable:$true] %s22_s28 }
   0x4   :  { %s323_s10 = smov 8   ;;  %s324_s11 = smov [#allocation4]  }
   0x5   :  { %28 = dma.hbm_to_vmem [thread:$0]  %s21_s26, 256, %s23_s28, [#allocation3], %s322_s9, %s322_s9, %s323_s10  }
   0x6   :  { %s36_s12 = sshll.u32 %s324_s11, 4  ;;  %s37_s12 = int_to_ptr.vmem [resolvable:$true] %s36_s12 }
   0x7   :  { %39 = dma.hbm_to_vmem [thread:$0]  %s35_s8, 16, %s37_s12, [#allocation5]  }
   0x8   :  { %317 = dma.done.wait [#allocation3], 256  }
   0x9   :  { %318 = vsyncadd [#allocation3], 4294967040 }
   0xa   :  { %319 = dma.done.wait [#allocation5], 16  }
   0xb   :  { %320 = vsyncadd [#allocation5], 4294967280  ;;  %vm67_vm0 = vcmask 1041408   ;;  %v58_v0 = vld [vmem:[#allocation2 + $0x8] sm:$0x3]  ;;  %v57_v1 = vld [vmem:[#allocation2] sm:$0xff] }
   0xc   :  { %v56_v2 = vld [vmem:[%s575_s0] sm:$0xff]  ;;  %259 = vmatpush.msk.msra.mxu0 %vm67_vm0, %v58_v0  ;;  %vm63_vm1 = vcmask 80896   ;;  %v122_v3 = vld [vmem:[%s578_s3 + $0xf0] sm:$0xff]  ;;  %v123_v4 = vld [vmem:[%s578_s3 + $0xf8] sm:$0xff]  ;;  %vm251_vm2 = vcmask 23552  }
   0xd   :  { %v120_v5 = vld [vmem:[%s578_s3 + $0xe0] sm:$0xff]  ;;  %130 = vmatpush.msra.mxu1 %v122_v3  ;;  %150 = vmatpush.msra.mxu2 %v123_v4  ;;  %v121_v6 = vld [vmem:[%s578_s3 + $0xe8] sm:$0xff]  ;;  %v118_v7 = vld [vmem:[%s578_s3 + $0xd0] sm:$0xff] }
   0xe   :  { %86 = vmatpush.msra.mxu0 %v57_v1  ;;  %v119_v8 = vld [vmem:[%s578_s3 + $0xd8] sm:$0xff]  ;;  %v116_v9 = vld [vmem:[%s578_s3 + $0xc0] sm:$0xff]  ;;  %v117_v10 = vld [vmem:[%s578_s3 + $0xc8] sm:$0xff] }
   0xf   :  { %260 = vmatmul.msk.f32.vlgmr.msra.gmra.mxu0 %vm63_vm1, %v56_v2  ;;  %131 = vmatpush.msra.mxu1 %v120_v5  ;;  %v114_v11 = vld [vmem:[%s578_s3 + $0xb0] sm:$0xff]  ;;  %v115_v12 = vld [vmem:[%s578_s3 + $0xb8] sm:$0xff]  ;;  %v112_v13 = vld [vmem:[%s578_s3 + $0xa0] sm:$0xff] }
  0x10   :  { %151 = vmatpush.msra.mxu2 %v121_v6  ;;  %v113_v14 = vld [vmem:[%s578_s3 + $0xa8] sm:$0xff]  ;;  %v110_v15 = vld [vmem:[%s578_s3 + $0x90] sm:$0xff]  ;;  %v111_v16 = vld [vmem:[%s578_s3 + $0x98] sm:$0xff] }
  0x11   :  { %132 = vmatpush.msra.mxu1 %v118_v7  ;;  %v108_v17 = vld [vmem:[%s578_s3 + $0x80] sm:$0xff]  ;;  %v109_v18 = vld [vmem:[%s578_s3 + $0x88] sm:$0xff]  ;;  %v106_v19 = vld [vmem:[%s578_s3 + $0x70] sm:$0xff] }
  0x12   :  { %152 = vmatpush.msra.mxu2 %v119_v8  ;;  %v107_v20 = vld [vmem:[%s578_s3 + $0x78] sm:$0xff]  ;;  %v104_v21 = vld [vmem:[%s578_s3 + $0x60] sm:$0xff]  ;;  %v105_v22 = vld [vmem:[%s578_s3 + $0x68] sm:$0xff] }
  0x13   :  { %133 = vmatpush.msra.mxu1 %v116_v9  ;;  %v102_v23 = vld [vmem:[%s578_s3 + $0x50] sm:$0xff]  ;;  %v103_v24 = vld [vmem:[%s578_s3 + $0x58] sm:$0xff]  ;;  %v100_v25 = vld [vmem:[%s578_s3 + $0x40] sm:$0xff] }
  0x14   :  { %153 = vmatpush.msra.mxu2 %v117_v10  ;;  %v101_v26 = vld [vmem:[%s578_s3 + $0x48] sm:$0xff]  ;;  %v98_v27 = vld [vmem:[%s578_s3 + $0x30] sm:$0xff]  ;;  %v99_v28 = vld [vmem:[%s578_s3 + $0x38] sm:$0xff] }
  0x15   :  { %134 = vmatpush.msra.mxu1 %v114_v11  ;;  %v96_v29 = vld [vmem:[%s578_s3 + $0x20] sm:$0xff]  ;;  %v97_v30 = vld [vmem:[%s578_s3 + $0x28] sm:$0xff]  ;;  %v94_v31 = vld [vmem:[%s578_s3 + $0x10] sm:$0xff] }
  0x16   :  { %154 = vmatpush.msra.mxu2 %v115_v12  ;;  %v95_v32 = vld [vmem:[%s578_s3 + $0x18] sm:$0xff]  ;;  %v92_v33 = vld [vmem:[%s578_s3] sm:$0xff]  ;;  %v93_v34 = vld [vmem:[%s578_s3 + $0x8] sm:$0xff] }
  0x17   :  { %135 = vmatpush.msra.mxu1 %v112_v13  ;;  %v187_v35 = vld [vmem:[%s580_s5 + $0x78] sm:$0xff]  ;;  %v186_v36 = vld [vmem:[%s580_s5 + $0x70] sm:$0xff]  ;;  %v185_v38 = vld [vmem:[%s580_s5 + $0x68] sm:$0xff] }
  0x18   :  { %155 = vmatpush.msra.mxu2 %v113_v14  ;;  %208 = vmatpush.msra.mxu3 %v187_v35  ;;  %v203_v37 = vld [vmem:[%s580_s5 + $0xf8] sm:$0xff]  ;;  %v202_v39 = vld [vmem:[%s580_s5 + $0xf0] sm:$0xff]  ;;  %v201_v40 = vld [vmem:[%s580_s5 + $0xe8] sm:$0xff] }
  0x19   :  { %136 = vmatpush.msra.mxu1 %v110_v15  ;;  %228 = vmatpush.msrb.mxu0 %v203_v37  ;;  %v184_v41 = vld [vmem:[%s580_s5 + $0x60] sm:$0xff]  ;;  %v183_v43 = vld [vmem:[%s580_s5 + $0x58] sm:$0xff]  ;;  %v182_v45 = vld [vmem:[%s580_s5 + $0x50] sm:$0xff] }
  0x1a   :  { %156 = vmatpush.msra.mxu2 %v111_v16  ;;  %209 = vmatpush.msra.mxu3 %v186_v36  ;;  %v200_v42 = vld [vmem:[%s580_s5 + $0xe0] sm:$0xff]  ;;  %v199_v44 = vld [vmem:[%s580_s5 + $0xd8] sm:$0xff]  ;;  %v198_v46 = vld [vmem:[%s580_s5 + $0xd0] sm:$0xff] }
  0x1b   :  { %137 = vmatpush.msra.mxu1 %v108_v17  ;;  %229 = vmatpush.msrb.mxu0 %v202_v39  ;;  %v181_v47 = vld [vmem:[%s580_s5 + $0x48] sm:$0xff]  ;;  %v180_v49 = vld [vmem:[%s580_s5 + $0x40] sm:$0xff]  ;;  %v179_v51 = vld [vmem:[%s580_s5 + $0x38] sm:$0xff] }
  0x1c   :  { %157 = vmatpush.msra.mxu2 %v109_v18  ;;  %210 = vmatpush.msra.mxu3 %v185_v38  ;;  %v197_v48 = vld [vmem:[%s580_s5 + $0xc8] sm:$0xff]  ;;  %v196_v50 = vld [vmem:[%s580_s5 + $0xc0] sm:$0xff]  ;;  %v195_v52 = vld [vmem:[%s580_s5 + $0xb8] sm:$0xff] }
  0x1d   :  { %138 = vmatpush.msra.mxu1 %v106_v19  ;;  %230 = vmatpush.msrb.mxu0 %v201_v40  ;;  %v178_v53 = vld [vmem:[%s580_s5 + $0x30] sm:$0xff]  ;;  %v177_v55 = vld [vmem:[%s580_s5 + $0x28] sm:$0xff]  ;;  %v176_v56 = vld [vmem:[%s580_s5 + $0x20] sm:$0xff] }
  0x1e   :  { %158 = vmatpush.msra.mxu2 %v107_v20  ;;  %211 = vmatpush.msra.mxu3 %v184_v41  ;;  %v194_v54 = vld [vmem:[%s580_s5 + $0xb0] sm:$0xff]  ;;  %v175_v57 = vld [vmem:[%s580_s5 + $0x18] sm:$0xff]  ;;  %v193_v63 = vld [vmem:[%s580_s5 + $0xa8] sm:$0xff] }
  0x1f   :  { %139 = vmatpush.msra.mxu1 %v104_v21  ;;  %231 = vmatpush.msrb.mxu0 %v200_v42  ;;  %v265_v58 = vld [vmem:[#allocation4] ss:$0 sm:$0xff]  ;;  %v173_v0 = vld [vmem:[%s580_s5 + $0x8] sm:$0xff]  ;;  %v192_v1 = vld [vmem:[%s580_s5 + $0xa0] sm:$0xff] }
  0x20   :  { %159 = vmatpush.msra.mxu2 %v105_v22  ;;  %212 = vmatpush.msra.mxu3 %v183_v43  ;;  %v174_v62 = vld [vmem:[%s580_s5 + $0x10] sm:$0xff]  ;;  %v172_v2 = vld [vmem:[%s580_s5] sm:$0xff]  ;;  %v191_v3 = vld [vmem:[%s580_s5 + $0x98] sm:$0xff] }
  0x21   :  { %140 = vmatpush.msra.mxu1 %v102_v23  ;;  %232 = vmatpush.msrb.mxu0 %v199_v44  ;;  %v190_v4 = vld [vmem:[%s580_s5 + $0x90] sm:$0xff]  ;;  %v189_v5 = vld [vmem:[%s580_s5 + $0x88] sm:$0xff]  ;;  %v188_v6 = vld [vmem:[%s580_s5 + $0x80] sm:$0xff] }
  0x22   :  { %160 = vmatpush.msra.mxu2 %v103_v24  ;;  %213 = vmatpush.msra.mxu3 %v182_v45  ;;  %v124_v7 = vld [vmem:[%s579_s4] sm:$0x3] }
  0x23   :  { %141 = vmatpush.msra.mxu1 %v100_v25  ;;  %233 = vmatpush.msrb.mxu0 %v198_v46  ;;  %v126_v8 = vperm.slane %v124_v7, 0  ;;  %v127_v12 = vperm.slane %v124_v7, 1  ;;  %v266_v16 = vld [vmem:[%s581_s6] ss:$0 sm:$0xff] }
  0x24   :  { %161 = vmatpush.msra.mxu2 %v101_v26  ;;  %214 = vmatpush.msra.mxu3 %v181_v47 }
  0x25   :  { %142 = vmatpush.msra.mxu1 %v98_v27  ;;  %234 = vmatpush.msrb.mxu0 %v197_v48 }
  0x26   :  { %162 = vmatpush.msra.mxu2 %v99_v28  ;;  %215 = vmatpush.msra.mxu3 %v180_v49 }
  0x27   :  { %143 = vmatpush.msra.mxu1 %v96_v29  ;;  %235 = vmatpush.msrb.mxu0 %v196_v50 }
  0x28   :  { %163 = vmatpush.msra.mxu2 %v97_v30  ;;  %216 = vmatpush.msra.mxu3 %v179_v51 }
  0x29   :  { %144 = vmatpush.msra.mxu1 %v94_v31  ;;  %236 = vmatpush.msrb.mxu0 %v195_v52 }
  0x2a   :  { %164 = vmatpush.msra.mxu2 %v95_v32  ;;  %217 = vmatpush.msra.mxu3 %v178_v53 }
  0x2b   :  { %145 = vmatpush.msra.mxu1 %v92_v33  ;;  %237 = vmatpush.msrb.mxu0 %v194_v54 }
  0x2c   :  { %165 = vmatpush.msra.mxu2 %v93_v34  ;;  %218 = vmatpush.msra.mxu3 %v177_v55 }
  0x2d   :  { %238 = vmatpush.msrb.mxu0 %v193_v63 }
  0x2e   :  { %219 = vmatpush.msra.mxu3 %v176_v56 }
  0x2f   :  { %239 = vmatpush.msrb.mxu0 %v192_v1 }
  0x30   :  { %220 = vmatpush.msra.mxu3 %v175_v57 }
  0x31   :  { %240 = vmatpush.msrb.mxu0 %v191_v3 }
  0x32   :  { %221 = vmatpush.msra.mxu3 %v174_v62 }
  0x33   :  { %241 = vmatpush.msrb.mxu0 %v190_v4 }
  0x34   :  { %222 = vmatpush.msra.mxu3 %v173_v0 }
  0x35   :  { %242 = vmatpush.msrb.mxu0 %v189_v5 }
  0x36   :  { %223 = vmatpush.msra.mxu3 %v172_v2 }
  0x37   :  { %243 = vmatpush.msrb.mxu0 %v188_v6 }
  0x8c   :  { %v88_v59 = vpop.f32.mrf.mxu0 }
  0x8d   :  { %v89_v60 = vadd.f32 %v265_v58, %v88_v59 }
  0x8f   :  { %v91_v61 = vmax.f32 %v89_v60, 0.0 }
  0x91   :  { %146 = vmatmul.f32.vlgmr.msra.gmra.mxu1 %v91_v61  ;;  %166 = vmatmul.f32.vlgmr.msra.gmra.mxu2 %v91_v61 }
 0x10e   :  { %v147_v9 = vpop.f32.mrf.mxu1 }
 0x10f   :  { %v148_v10 = vadd.f32 %v147_v9, %v126_v8 }
 0x111   :  { %v170_v11 = vmax.f32 %v148_v10, 0.0 }
 0x113   :  { %224 = vmatmul.f32.vlgmr.msra.gmra.mxu3 %v170_v11 }
 0x114   :  { %v167_v13 = vpop.f32.mrf.mxu2 }
 0x115   :  { %v168_v14 = vadd.f32 %v167_v13, %v127_v12 }
 0x117   :  { %v171_v15 = vmax.f32 %v168_v14, 0.0 }
 0x119   :  { %244 = vmatmul.f32.vlgmr.msrb.gmra.mxu0 %v171_v15 }
 0x196   :  { %v225_v17 = vpop.f32.mrf.mxu3  ;;  %v245_v19 = vpop.f32.mrf.mxu0 }
 0x197   :  { %v226_v18 = vadd.f32 %v266_v16, %v225_v17 }
 0x199   :  { %v246_v20 = vadd.f32 %v245_v19, %v226_v18 }
 0x19b   :  { %267 = vtanh.f32 %v246_v20 }
 0x1a1   :  { %v268_v21 = vpop.eup %267 }
 0x1a2   :  { %v249_v22 = vmul.f32 2.75, %v268_v21 }
 0x1a4   :  { %v250_v23 = vadd.f32 3.25, %v249_v22 }
 0x1a6   :  { %252 = vst.msk [vmem:[%s582_s7] sm:$0xff] %vm251_vm2, %v250_v23 }
 0x1a7   :  { %257 = vsyncpa [#allocation3], 1 }
 0x1a8   :  { %258 = vsyncpa [#allocation5], 1 }

</bundles_post_ra>
